<compile_context>
chip_gen: v5e
topology: v5e:2x2
jax: 0.10.0
libtpu: 0.0.40
codegen_flags: <defaults>
</compile_context>

<pallas_src>
import jax
import jax.numpy as jnp
from jax import lax
from jax.experimental import pallas as pl
from jax.experimental.pallas import tpu as pltpu

MAX_NORM = 1.0
EPS = 1e-7

LANE = 128       # lane width (last-dim alignment)
SUBLANE = 8      # sublane alignment (f32)
TB_MAX = 1024    # max batch-tile rows per grid step (big tiles amortize ~0.35 us/step)


def _round_up(x, m):
    return ((x + m - 1) // m) * m


# --------------------------------------------------------------------------------------
# Fused kernel: one-hot MXU gather + per-tile max-norm renormalization.
# --------------------------------------------------------------------------------------
def _embed_kernel(ids_ref, table_ref, out_ref):
    # ids_ref  : VMEM (TB, 1)            int32   (per-tile ids block)
    # table_ref: VMEM (ns_pad, n_pad)    weight table, single resident copy
    # out_ref  : VMEM (TB, n_pad)        output tile for this grid step
    tb = out_ref.shape[0]
    ns_pad = table_ref.shape[0]

    ids = ids_ref[...]                                            # (TB, 1)
    col = lax.broadcasted_iota(jnp.int32, (tb, ns_pad), 1)        # (TB, ns_pad)
    onehot = (col == ids).astype(table_ref.dtype)                 # (TB, ns_pad)

    # Gather all TB rows in one MXU matmul (f32 accumulation).
    rows = jnp.dot(onehot, table_ref[...],
                   preferred_element_type=jnp.float32)            # (TB, n_pad) f32

    # Fused max_norm=1.0 renorm (zero-padded lanes do not change the row norms).
    sq = jnp.sum(rows * rows, axis=-1, keepdims=True)             # (TB, 1)
    norm = jnp.sqrt(sq)
    scale = jnp.where(norm > MAX_NORM, MAX_NORM / (norm + EPS), 1.0)
    out_ref[...] = (rows * scale).astype(out_ref.dtype)


# --------------------------------------------------------------------------------------
# Wrapper
# --------------------------------------------------------------------------------------
def tabular_embedding_forward(set_id, set_emb_weight, *, tb_max=TB_MAX):
    """Pallas equivalent of TabularEmbedding.forward(set_id)."""
    set_id = jnp.squeeze(set_id)                 # mirrors set_id.squeeze_()
    batch_shape = set_id.shape                   # may be () for a single index
    flat_ids = set_id.reshape(-1).astype(jnp.int32)
    B = flat_ids.shape[0]

    num_sets, n = set_emb_weight.shape
    n_pad = _round_up(n, LANE)                   # lane-align feature dim
    ns_pad = _round_up(num_sets, SUBLANE)        # sublane-align table rows
    w = set_emb_weight
    if (ns_pad, n_pad) != (num_sets, n):
        # zero padding: pad rows are never selected (valid ids < num_sets), pad lanes
        # do not change norms, and both are sliced off at the end.
        w = jnp.pad(w, ((0, ns_pad - num_sets), (0, n_pad - n)))

    # Batch tiling.
    B_pad = _round_up(max(B, SUBLANE), SUBLANE)
    TB = _round_up(min(tb_max, B_pad), SUBLANE)
    B_pad = _round_up(B_pad, TB)
    num_tiles = B_pad // TB
    ids2d = jnp.pad(flat_ids, (0, B_pad - B)).reshape(B_pad, 1)   # pad with row 0, sliced off

    itemsize = jnp.dtype(w.dtype).itemsize
    vmem_need = (
        ns_pad * n_pad * itemsize            # resident table (single copy, not double-buffered)
        + 2 * TB * LANE * 4                  # ids blocks (lane-padded, double-buffered)
        + 2 * TB * n_pad * itemsize          # output tiles (double-buffered)
        + TB * ns_pad * 4                    # one-hot intermediate (f32)
        + 2 * TB * n_pad * 4                 # f32 matmul result + scaled intermediate
        + (4 << 20)                          # headroom
    )
    vmem_limit = int(max(vmem_need, 32 * 1024 * 1024))

    out = pl.pallas_call(
        _embed_kernel,
        out_shape=jax.ShapeDtypeStruct((B_pad, n_pad), w.dtype),
        grid=(num_tiles,),
        in_specs=[
            pl.BlockSpec((TB, 1), lambda i: (i, 0)),                   # per-tile ids
            pl.BlockSpec(memory_space=pltpu.MemorySpace.VMEM),         # whole table, 1 copy
        ],
        out_specs=pl.BlockSpec((TB, n_pad), lambda i: (i, 0)),
        compiler_params=pltpu.CompilerParams(
            dimension_semantics=("parallel",),   # batch tiles independent (v7x megacore)
            vmem_limit_bytes=vmem_limit,
        ),
    )(ids2d, w)

    out = out[:B, :n]
    return out.reshape(batch_shape + (n,))


def _reference(set_id, set_emb_weight):
    ids = jnp.squeeze(set_id).astype(jnp.int32)
    rows = set_emb_weight[ids]
    norms = jnp.linalg.norm(rows.astype(jnp.float32), axis=-1, keepdims=True)
    scale = jnp.where(norms > MAX_NORM, MAX_NORM / (norms + EPS), 1.0)
    return (rows * scale).astype(set_emb_weight.dtype)


if __name__ == "__main__":
    # Module hyperparams (small, lane-friendly shapes)
    m, n, num_sets = 10, 128, 16
    B = 8

    key = jax.random.PRNGKey(0)
    k_ele, k_set, k_ids = jax.random.split(key, 3)

    # nn.Embedding weights init ~ N(0, 1)
    ele_emb_weight = jax.random.normal(k_ele, (m, n), dtype=jnp.float32)  # unused in forward
    set_emb_weight = jax.random.normal(k_set, (num_sets, n), dtype=jnp.float32)

    # set_id arrives as (B, 1); forward squeezes it to (B,)
    set_id = jax.random.randint(k_ids, (B, 1), 0, num_sets, dtype=jnp.int32)

    out = tabular_embedding_forward(set_id, set_emb_weight)
    out = jax.block_until_ready(out)
    ref = _reference(set_id, set_emb_weight)
    assert out.shape == (B, n), out.shape
    assert jnp.allclose(out, ref, atol=1e-5, rtol=1e-5), "mismatch vs reference (small case)"

    # Second check: non-aligned n and num_sets, larger ragged batch -> exercises padding +
    # multi-tile grid + parallel batch axis (small tile cap just to force >1 grid step).
    n2, num_sets2, B2 = 96, 37, 300
    k_set2, k_ids2 = jax.random.split(jax.random.PRNGKey(1), 2)
    set_emb_weight2 = jax.random.normal(k_set2, (num_sets2, n2), dtype=jnp.float32)
    set_id2 = jax.random.randint(k_ids2, (B2, 1), 0, num_sets2, dtype=jnp.int32)

    out2 = tabular_embedding_forward(set_id2, set_emb_weight2, tb_max=128)
    out2 = jax.block_until_ready(out2)
    ref2 = _reference(set_id2, set_emb_weight2)
    assert out2.shape == (B2, n2), out2.shape
    assert jnp.allclose(out2, ref2, atol=1e-5, rtol=1e-5), "mismatch vs reference (tiled case)"

    print("KERNEL_OK")
</pallas_src>

<mosaic_0001>
module attributes {stable_mosaic.version = 11 : i64} {
  func.func @_embed_kernel(%arg0: i32, %arg1: memref<8x1xi32, #tpu.memory_space<vmem>>, %arg2: memref<16x128xf32, #tpu.memory_space<vmem>>, %arg3: memref<8x128xf32, #tpu.memory_space<vmem>>) attributes {dimension_semantics = [#tpu.dimension_semantics<parallel>], iteration_bounds = array<i64: 1>, scalar_prefetch = 0 : i64, scratch_operands = 0 : i64, tpu.core_type = #tpu.core_type<tc>, window_params = [{transform_indices = @transform_0, window_bounds = array<i64: 8, 1>}, {pipeline_mode = #tpu.pipeline_mode<synchronous>, transform_indices = @transform_1, window_bounds = array<i64: 16, 128>}, {transform_indices = @transform_2, window_bounds = array<i64: 8, 128>}]} {
    %c0 = arith.constant 0 : index
    %c0_0 = arith.constant 0 : index
    %0 = vector.load %arg1[%c0, %c0_0] : memref<8x1xi32, #tpu.memory_space<vmem>>, vector<8x1xi32>
    %1 = tpu.iota {dimensions = array<i32: 1>} : vector<8x16xi32>
    %2 = vector.broadcast %0 : vector<8x1xi32> to vector<8x16xi32>
    %3 = arith.cmpi eq, %1, %2 : vector<8x16xi32>
    %4 = arith.extui %3 : vector<8x16xi1> to vector<8x16xi32>
    %5 = arith.sitofp %4 : vector<8x16xi32> to vector<8x16xf32>
    %c0_1 = arith.constant 0 : index
    %c0_2 = arith.constant 0 : index
    %6 = vector.load %arg2[%c0_1, %c0_2] : memref<16x128xf32, #tpu.memory_space<vmem>>, vector<16x128xf32>
    %cst = arith.constant dense<0.000000e+00> : vector<8x128xf32>
    %7 = tpu.matmul %5, %6, %cst {dimension_numbers = #tpu.dot_dimension_numbers<[1], [0], [0], [1], [0, 0, 1, 1], [], []>} : vector<8x16xf32>, vector<16x128xf32>, vector<8x128xf32> -> vector<8x128xf32>
    %8 = arith.mulf %7, %7 : vector<8x128xf32>
    %cst_3 = arith.constant dense<0.000000e+00> : vector<8xf32>
    %9 = vector.multi_reduction <add>, %8, %cst_3 [1] : vector<8x128xf32> to vector<8xf32>
    %10 = vector.shape_cast %9 : vector<8xf32> to vector<8x1xf32>
    %11 = math.sqrt %10 : vector<8x1xf32>
    %cst_4 = arith.constant 1.000000e+00 : f32
    %12 = vector.broadcast %cst_4 : f32 to vector<8x1xf32>
    %13 = arith.cmpf ogt, %11, %12 : vector<8x1xf32>
    %cst_5 = arith.constant 1.000000e-07 : f32
    %14 = vector.broadcast %cst_5 : f32 to vector<8x1xf32>
    %15 = arith.addf %11, %14 : vector<8x1xf32>
    %cst_6 = arith.constant 1.000000e+00 : f32
    %16 = vector.broadcast %cst_6 : f32 to vector<8x1xf32>
    %17 = arith.divf %16, %15 : vector<8x1xf32>
    %cst_7 = arith.constant 1.000000e+00 : f32
    %18 = vector.broadcast %cst_7 : f32 to vector<8x1xf32>
    %19 = arith.select %13, %17, %18 : vector<8x1xi1>, vector<8x1xf32>
    %20 = vector.broadcast %19 : vector<8x1xf32> to vector<8x128xf32>
    %21 = arith.mulf %7, %20 : vector<8x128xf32>
    %c0_8 = arith.constant 0 : index
    %c0_9 = arith.constant 0 : index
    %22 = vector.load %arg3[%c0_8, %c0_9] : memref<8x128xf32, #tpu.memory_space<vmem>>, vector<8x128xf32>
    tpu.vector_store %arg3[%c0_8, %c0_9], %21 {strides = array<i32>} : memref<8x128xf32, #tpu.memory_space<vmem>>, vector<8x128xf32>,
    return
  }
  func.func @transform_0(%arg0: i32) -> (i32, i32) {
    %c0_i32 = arith.constant 0 : i32
    %c0_i32_0 = arith.constant 0 : i32
    return %arg0, %c0_i32 : i32, i32
  }
  func.func @transform_1(%arg0: i32) -> (i32, i32) {
    %c0_i32 = arith.constant 0 : i32
    %c0_i32_0 = arith.constant 0 : i32
    %c0_i32_1 = arith.constant 0 : i32
    return %c0_i32, %c0_i32_0 : i32, i32
  }
  func.func @transform_2(%arg0: i32) -> (i32, i32) {
    %c0_i32 = arith.constant 0 : i32
    %c0_i32_0 = arith.constant 0 : i32
    return %arg0, %c0_i32 : i32, i32
  }
}

</mosaic_0001>

<bundles_post_ra>
// kernel: tpu_custom_call.1
= control target key start
LH: loop header
LB: loop body
LE: loop exit
PB: predicated region body
PF: predicated region fallthrough
CT: control target
= control target key end

     0   :  { %7 = vsyncpa [#allocation3], 0  ;;  %s210_s0 = inlined_call_operand.vmem [shape: s32[8,1], index: 0, kind: input, shape index: {}]   ;;  %s211_s1 = inlined_call_operand.hbm [shape: f32[16,128], index: 1, kind: input, shape index: {}]   ;;  %s212_s2 = inlined_call_operand.hbm [shape: f32[8,128], index: 2, kind: output, shape index: {}]  }
   0x1   :  { %8 = vsyncpa [#allocation4], 0  ;;  %s15_s11 = sshll.u32 %s211_s1, 4  ;;  %s180_s12 = smov [#allocation2]   ;;  %s16_s11 = int_to_ptr.hbm [resolvable:$true] %s15_s11 }
   0x2   :  { %s17_s13 = sshll.u32 %s180_s12, 4  ;;  %s181_s14 = smov 128   ;;  %s18_s13 = int_to_ptr.vmem [resolvable:$true] %s17_s13 }
   0x3   :  { %s182_s15 = smov 8  }
   0x4   :  { %23 = dma.hbm_to_vmem [thread:$0]  %s16_s11, 256, %s18_s13, [#allocation3], %s181_s14, %s181_s14, %s182_s15  }
   0x5   :  { %176 = dma.done.wait [#allocation3], 256  }
   0x6   :  { %177 = vsyncadd [#allocation3], 4294967040  ;;  %v183_v0 = vmov 0   ;;  %v28_v1 = vld [vmem:[%s210_s0] sm:$0xff]  ;;  %v38_v2 = vld [vmem:[#allocation2 + $0x8] sm:$0xff]  ;;  %v29_v4 = vlaneseq  ;;  %vm39_vm0 = vcmask 130048  }
   0x7   :  { %123 = vset.pattern.permute.xlu0 %v183_v0  ;;  %57 = vmatpush.msra.mxu0 %v38_v2  ;;  %v37_v3 = vld [vmem:[#allocation2] sm:$0xff]  ;;  %v184_v7 = vmov 0.0   ;;  %s185_s0 = smov [#allocation5]   ;;  %s105_s20 = sshll.u32 %s212_s2, 4  ;;  %s106_s20 = int_to_ptr.hbm [resolvable:$true] %s105_s20 }
   0x8   :  { %32 = vperm.xlu0 %123, %v28_v1   ;;  %v30_v5 = vand.u32 127, %v29_v4  ;;  %s103_s1 = sshll.u32 %s185_s0, 4  ;;  %s104_s1 = int_to_ptr.vmem [resolvable:$true] %s103_s1 }
   0x9   :  { %58 = vmatpush.msra.mxu0 %v37_v3 }
  0x7a   :  { %v33_v6 = vpop.permute.xlu0 %32 }
  0x7b   :  { %vm34_vm1 = vcmp.eq.s32.totalorder %v30_v5, %v33_v6 }
  0x7c   :  { %v115_v8 = vsel %vm34_vm1, 1.0, %v184_v7 }
  0x7d   :  { %116 = vmatmul.msk.f32.vlgmr.msra.gmra.mxu0 %vm39_vm0, %v115_v8 }
  0xfa   :  { %v60_v9 = vpop.f32.mrf.mxu0 }
  0xfb   :  { %v63_v10 = vmul.f32 %v60_v9, %v60_v9 }
  0xfd   :  { %64 = vadd.xlane.f32.xlu0 %v63_v10 }
 0x170   :  { %v65_v11 = vpop.xlane.xlu0 %64 }
 0x171   :  { %124 = vrsqrt.f32 %v65_v11  ;;  %vm73_vm2 = vcmp.eq.f32.partialorder %v65_v11, inf  ;;  %v76_v19 = vand.u32 2147483648, %v65_v11  ;;  %vm75_vm3 = vcmp.eq.f32.partialorder %v65_v11, 0.0 }
 0x177   :  { %v125_v12 = vpop.eup %124 }
 0x178   :  { %v67_v13 = vmul.f32 %v125_v12, %v65_v11 }
 0x17a   :  { %v68_v14 = vmul.f32 %v125_v12, %v67_v13 }
 0x17c   :  { %v69_v15 = vmul.f32 0.5, %v68_v14 }
 0x17e   :  { %v70_v16 = vsub.f32 1.5, %v69_v15 }
 0x180   :  { %v71_v17 = vmul.f32 %v125_v12, %v70_v16 }
 0x182   :  { %v72_v18 = vmul.f32 %v71_v17, %v65_v11 }
 0x184   :  { %v74_v20 = vsel %vm73_vm2, %v65_v11, %v72_v18 }
 0x185   :  { %v77_v21 = vsel %vm75_vm3, %v76_v19, %v74_v20 }
 0x186   :  { %v79_v22 = vadd.f32 1e-07, %v77_v21  ;;  %vm78_vm8 = vcmp.gt.f32.partialorder %v77_v21, 1.0 }
 0x188   :  { %126 = vrcp.f32 %v79_v22  ;;  %v91_v26 = vand.u32 2147483648, %v79_v22  ;;  %v89_v28 = vand.u32 2147483647, %v79_v22  ;;  %vm85_vm5 = vweird.f32 %v79_v22 }
 0x18a   :  { %v92_v30 = vor.u32 1.1754944e-38, %v91_v26  ;;  %vm90_vm7 = vcmp.eq.f32.partialorder %v89_v28, 8.507059e+37 }
 0x18e   :  { %v127_v23 = vpop.eup %126 }
 0x18f   :  { %v81_v24 = vmul.f32 %v127_v23, %v79_v22  ;;  %vm86_vm4 = vweird.f32 %v127_v23 }
 0x190   :  { %vm87_vm6 = vmor %vm85_vm5, %vm86_vm4 }
 0x191   :  { %v82_v25 = vsub.f32 1.0, %v81_v24 }
 0x193   :  { %v83_v27 = vmul.f32 %v127_v23, %v82_v25 }
 0x195   :  { %v84_v29 = vadd.f32 %v127_v23, %v83_v27 }
 0x197   :  { %v88_v31 = vsel %vm87_vm6, %v127_v23, %v84_v29 }
 0x198   :  { %v93_v32 = vsel %vm90_vm7, %v92_v30, %v88_v31 }
 0x199   :  { %v95_v33 = vsel %vm78_vm8, %v93_v32, 1.0 }
 0x19a   :  { %v96_v34 = vmul.f32 %v95_v33, %v60_v9 }
 0x19c   :  { %97 = vst [vmem:[#allocation5] sm:$0xff] %v96_v34 }
 0x19d   :  { %108 = dma.vmem_to_hbm [thread:$0]  %s104_s1, 128, %s106_s20, [#allocation4]  }
 0x19e   :  { %178 = dma.done.wait [#allocation4], 128  }
 0x19f   :  { %179 = vsyncadd [#allocation4], 4294967168 }
 0x1a0   :  { %113 = vsyncpa [#allocation3], 1 }
 0x1a1   :  { %114 = vsyncpa [#allocation4], 1 }

</bundles_post_ra>
